<compile_context>
chip_gen: v7x
topology: tpu7x:2x2x1
jax: 0.10.0
libtpu: 0.0.40
codegen_flags: <defaults>
</compile_context>

<pallas_src>
import functools

import jax
import jax.numpy as jnp
from jax.experimental import pallas as pl
from jax.experimental.pallas import tpu as pltpu

LANE = 128           # pad final layer / output to lane width
TB_MAX = 4096        # max batch-tile rows per grid step (amortizes ~0.35us/step)
TB_MIN_SPLIT = 512   # batches >= this get >=2 grid steps (feeds both v7x TCs)


def _round_up(n, m):
    return ((n + m - 1) // m) * m


def dqn_kernel(x_ref, w1_ref, b1_ref, w2_ref, b2_ref, w3_ref, b3_ref, o_ref):
    # x arrives f32; cast to bf16 here (cheaper than a wrapper-side astype
    # pass: one HBM read instead of read+write+read).
    x = x_ref[...].astype(jnp.bfloat16)

    # Layer 1: Linear(4, 64) + ReLU.  bf16 operands -> MXU, f32 accumulate.
    h1 = jnp.dot(x, w1_ref[...], preferred_element_type=jnp.float32)
    h1 = jnp.maximum(h1 + b1_ref[...], 0.0)

    # Layer 2: Linear(64, 64) + ReLU.
    h2 = jnp.dot(h1.astype(jnp.bfloat16), w2_ref[...],
                 preferred_element_type=jnp.float32)
    h2 = jnp.maximum(h2 + b2_ref[...], 0.0)

    # Layer 3: Linear(64, 128-padded actions), no activation.
    out = jnp.dot(h2.astype(jnp.bfloat16), w3_ref[...],
                  preferred_element_type=jnp.float32)
    # bf16 store halves output writeback bytes (the dominant HBM traffic).
    o_ref[...] = (out + b3_ref[...]).astype(o_ref.dtype)


def prepare_dqn_params(params, num_actions):
    """One-time prep: pad the final layer to 128 lanes and pre-cast weights
    to bf16.  Hoisted out of the hot forward path."""
    w1, b1, w2, b2, w3, b3 = params
    w3p = jnp.zeros((w3.shape[0], LANE), jnp.float32).at[:, :num_actions].set(w3)
    b3p = jnp.zeros((1, LANE), jnp.float32).at[:, :num_actions].set(b3)
    w1_bf, w2_bf, w3_bf = (w.astype(jnp.bfloat16) for w in (w1, w2, w3p))
    return (w1_bf, b1, w2_bf, b2, w3_bf, b3p)


def _choose_tiling(B):
    """Pick (tile_rows, padded_batch).

    - tile rows are a multiple of 16 (bf16 sublane tile; also satisfies f32's 8)
    - avoids the up-to-2x padding blowup of round_up(B, TB_MAX)
    - keeps >=2 grid steps once the batch is large enough (v7x megacore)
    """
    B16 = _round_up(B, 16)
    n_steps = pl.cdiv(B16, TB_MAX)
    if B16 >= TB_MIN_SPLIT:
        n_steps = max(n_steps, 2)
    tb = _round_up(pl.cdiv(B16, n_steps), 16)
    B_pad = _round_up(B16, tb)
    return tb, B_pad


@functools.partial(jax.jit, static_argnames=("num_actions",))
def dqn_forward(x, prepared_params, num_actions):
    """3-layer MLP forward in one Pallas kernel, batch-tiled over a 1-D grid."""
    w1_bf, b1, w2_bf, b2, w3_bf, b3p = prepared_params
    B, F = x.shape
    assert F == 4

    tb, B_pad = _choose_tiling(B)
    if B_pad != B:
        x = jnp.pad(x, ((0, B_pad - B), (0, 0)))
    grid = (B_pad // tb,)

    # Weights / biases: full-array blocks with constant index_map -> resident
    # in VMEM, DMA'd once.  x / out: tiled over the batch grid axis.
    const2d = lambda a: pl.BlockSpec(a.shape, lambda i: (0, 0))

    flops = 2 * B_pad * (4 * 64 + 64 * 64 + 64 * LANE)
    bytes_accessed = (x.size * 4                          # f32 input read
                      + B_pad * LANE * 2                  # bf16 output write
                      + (w1_bf.size + w2_bf.size + w3_bf.size) * 2
                      + (b1.size + b2.size + b3p.size) * 4)

    out_padded = pl.pallas_call(
        dqn_kernel,
        out_shape=jax.ShapeDtypeStruct((B_pad, LANE), jnp.bfloat16),
        grid=grid,
        in_specs=[
            pl.BlockSpec((tb, F), lambda i: (i, 0)),      # x: batch-tiled, f32
            const2d(w1_bf), const2d(b1),
            const2d(w2_bf), const2d(b2),
            const2d(w3_bf), const2d(b3p),
        ],
        out_specs=pl.BlockSpec((tb, LANE), lambda i: (i, 0)),
        compiler_params=pltpu.CompilerParams(
            dimension_semantics=("parallel",),
            # v5e default scoped VMEM is only 16 MiB; raise so big tiles fit.
            vmem_limit_bytes=32 << 20,
        ),
        cost_estimate=pl.CostEstimate(
            flops=flops, transcendentals=0, bytes_accessed=bytes_accessed),
    )(x, w1_bf, b1, w2_bf, b2, w3_bf, b3p)

    # Drop batch/lane padding; widen the tiny Q-value slice back to f32.
    return out_padded[:B, :num_actions].astype(jnp.float32)


def init_dqn_params(key, num_actions):
    """Deterministic init mimicking nn.Linear default U(-1/sqrt(fan_in), +...)."""
    sizes = [(4, 64), (64, 64), (64, num_actions)]
    params = []
    for fan_in, fan_out in sizes:
        kw, kb, key = jax.random.split(key, 3)
        bound = 1.0 / jnp.sqrt(jnp.float32(fan_in))
        w = jax.random.uniform(kw, (fan_in, fan_out), jnp.float32, -bound, bound)
        b = jax.random.uniform(kb, (1, fan_out), jnp.float32, -bound, bound)
        params += [w, b]
    return params


def dqn_reference(x, params):
    w1, b1, w2, b2, w3, b3 = params
    h1 = jnp.maximum(x @ w1 + b1, 0.0)
    h2 = jnp.maximum(h1 @ w2 + b2, 0.0)
    return h2 @ w3 + b3


if __name__ == "__main__":
    key = jax.random.PRNGKey(0)
    k_x, k_x2, k_p = jax.random.split(key, 3)

    num_actions = 2  # CartPole-style action space
    params = init_dqn_params(k_p, num_actions)
    prepared = prepare_dqn_params(params, num_actions)

    # Small acting-loop-style batch.
    batch = 8
    x = jax.random.normal(k_x, (batch, 4), jnp.float32)
    out = jax.block_until_ready(dqn_forward(x, prepared, num_actions))
    ref = dqn_reference(x, params)
    assert out.shape == (batch, num_actions)
    # bf16 MXU operands + bf16 output store vs f32 reference: loose tolerance.
    assert jnp.allclose(out, ref, atol=3e-2, rtol=3e-2), (
        f"max abs err {jnp.max(jnp.abs(out - ref))}")

    # Larger, non-multiple batch: exercises adaptive tiling / padding /
    # multi-step grid path.
    batch2 = 600
    x2 = jax.random.normal(k_x2, (batch2, 4), jnp.float32)
    out2 = jax.block_until_ready(dqn_forward(x2, prepared, num_actions))
    ref2 = dqn_reference(x2, params)
    assert out2.shape == (batch2, num_actions)
    assert jnp.allclose(out2, ref2, atol=3e-2, rtol=3e-2), (
        f"max abs err {jnp.max(jnp.abs(out2 - ref2))}")

    print("KERNEL_OK")
</pallas_src>

<mosaic_0001>
module attributes {stable_mosaic.version = 11 : i64} {
  func.func @dqn_kernel(%arg0: i32, %arg1: memref<16x4xf32, #tpu.memory_space<vmem>>, %arg2: memref<4x64xbf16, #tpu.memory_space<vmem>>, %arg3: memref<1x64xf32, #tpu.memory_space<vmem>>, %arg4: memref<64x64xbf16, #tpu.memory_space<vmem>>, %arg5: memref<1x64xf32, #tpu.memory_space<vmem>>, %arg6: memref<64x128xbf16, #tpu.memory_space<vmem>>, %arg7: memref<1x128xf32, #tpu.memory_space<vmem>>, %arg8: memref<16x128xbf16, #tpu.memory_space<vmem>>) attributes {dimension_semantics = [#tpu.dimension_semantics<parallel>], iteration_bounds = array<i64: 1>, scalar_prefetch = 0 : i64, scratch_operands = 0 : i64, tpu.core_type = #tpu.core_type<tc>, window_params = [{transform_indices = @transform_0, window_bounds = array<i64: 16, 4>}, {pipeline_mode = #tpu.pipeline_mode<synchronous>, transform_indices = @transform_1, window_bounds = array<i64: 4, 64>}, {pipeline_mode = #tpu.pipeline_mode<synchronous>, transform_indices = @transform_2, window_bounds = array<i64: 1, 64>}, {pipeline_mode = #tpu.pipeline_mode<synchronous>, transform_indices = @transform_3, window_bounds = array<i64: 64, 64>}, {pipeline_mode = #tpu.pipeline_mode<synchronous>, transform_indices = @transform_4, window_bounds = array<i64: 1, 64>}, {pipeline_mode = #tpu.pipeline_mode<synchronous>, transform_indices = @transform_5, window_bounds = array<i64: 64, 128>}, {pipeline_mode = #tpu.pipeline_mode<synchronous>, transform_indices = @transform_6, window_bounds = array<i64: 1, 128>}, {transform_indices = @transform_7, window_bounds = array<i64: 16, 128>}]} {
    %c0 = arith.constant 0 : index
    %c0_0 = arith.constant 0 : index
    %0 = vector.load %arg1[%c0, %c0_0] : memref<16x4xf32, #tpu.memory_space<vmem>>, vector<16x4xf32>
    %1 = arith.truncf %0 : vector<16x4xf32> to vector<16x4xbf16>
    %c0_1 = arith.constant 0 : index
    %c0_2 = arith.constant 0 : index
    %2 = vector.load %arg2[%c0_1, %c0_2] : memref<4x64xbf16, #tpu.memory_space<vmem>>, vector<4x64xbf16>
    %cst = arith.constant dense<0.000000e+00> : vector<16x64xf32>
    %3 = tpu.matmul %1, %2, %cst {dimension_numbers = #tpu.dot_dimension_numbers<[1], [0], [0], [1], [0, 0, 1, 1], [], []>} : vector<16x4xbf16>, vector<4x64xbf16>, vector<16x64xf32> -> vector<16x64xf32>
    %c0_3 = arith.constant 0 : index
    %c0_4 = arith.constant 0 : index
    %4 = vector.load %arg3[%c0_3, %c0_4] : memref<1x64xf32, #tpu.memory_space<vmem>>, vector<1x64xf32>
    %5 = vector.broadcast %4 : vector<1x64xf32> to vector<16x64xf32>
    %6 = arith.addf %3, %5 : vector<16x64xf32>
    %cst_5 = arith.constant 0.000000e+00 : f32
    %7 = vector.broadcast %cst_5 : f32 to vector<16x64xf32>
    %8 = arith.maximumf %6, %7 : vector<16x64xf32>
    %9 = arith.truncf %8 : vector<16x64xf32> to vector<16x64xbf16>
    %c0_6 = arith.constant 0 : index
    %c0_7 = arith.constant 0 : index
    %10 = vector.load %arg4[%c0_6, %c0_7] : memref<64x64xbf16, #tpu.memory_space<vmem>>, vector<64x64xbf16>
    %cst_8 = arith.constant dense<0.000000e+00> : vector<16x64xf32>
    %11 = tpu.matmul %9, %10, %cst_8 {dimension_numbers = #tpu.dot_dimension_numbers<[1], [0], [0], [1], [0, 0, 1, 1], [], []>} : vector<16x64xbf16>, vector<64x64xbf16>, vector<16x64xf32> -> vector<16x64xf32>
    %c0_9 = arith.constant 0 : index
    %c0_10 = arith.constant 0 : index
    %12 = vector.load %arg5[%c0_9, %c0_10] : memref<1x64xf32, #tpu.memory_space<vmem>>, vector<1x64xf32>
    %13 = vector.broadcast %12 : vector<1x64xf32> to vector<16x64xf32>
    %14 = arith.addf %11, %13 : vector<16x64xf32>
    %cst_11 = arith.constant 0.000000e+00 : f32
    %15 = vector.broadcast %cst_11 : f32 to vector<16x64xf32>
    %16 = arith.maximumf %14, %15 : vector<16x64xf32>
    %17 = arith.truncf %16 : vector<16x64xf32> to vector<16x64xbf16>
    %c0_12 = arith.constant 0 : index
    %c0_13 = arith.constant 0 : index
    %18 = vector.load %arg6[%c0_12, %c0_13] : memref<64x128xbf16, #tpu.memory_space<vmem>>, vector<64x128xbf16>
    %cst_14 = arith.constant dense<0.000000e+00> : vector<16x128xf32>
    %19 = tpu.matmul %17, %18, %cst_14 {dimension_numbers = #tpu.dot_dimension_numbers<[1], [0], [0], [1], [0, 0, 1, 1], [], []>} : vector<16x64xbf16>, vector<64x128xbf16>, vector<16x128xf32> -> vector<16x128xf32>
    %c0_15 = arith.constant 0 : index
    %c0_16 = arith.constant 0 : index
    %20 = vector.load %arg7[%c0_15, %c0_16] : memref<1x128xf32, #tpu.memory_space<vmem>>, vector<1x128xf32>
    %21 = vector.broadcast %20 : vector<1x128xf32> to vector<16x128xf32>
    %22 = arith.addf %19, %21 : vector<16x128xf32>
    %23 = arith.truncf %22 : vector<16x128xf32> to vector<16x128xbf16>
    %c0_17 = arith.constant 0 : index
    %c0_18 = arith.constant 0 : index
    %24 = vector.load %arg8[%c0_17, %c0_18] : memref<16x128xbf16, #tpu.memory_space<vmem>>, vector<16x128xbf16>
    tpu.vector_store %arg8[%c0_17, %c0_18], %23 {strides = array<i32>} : memref<16x128xbf16, #tpu.memory_space<vmem>>, vector<16x128xbf16>,
    return
  }
  func.func @transform_0(%arg0: i32) -> (i32, i32) {
    %c0_i32 = arith.constant 0 : i32
    %c0_i32_0 = arith.constant 0 : i32
    return %arg0, %c0_i32 : i32, i32
  }
  func.func @transform_1(%arg0: i32) -> (i32, i32) {
    %c0_i32 = arith.constant 0 : i32
    %c0_i32_0 = arith.constant 0 : i32
    %c0_i32_1 = arith.constant 0 : i32
    return %c0_i32, %c0_i32_0 : i32, i32
  }
  func.func @transform_2(%arg0: i32) -> (i32, i32) {
    %c0_i32 = arith.constant 0 : i32
    %c0_i32_0 = arith.constant 0 : i32
    %c0_i32_1 = arith.constant 0 : i32
    return %c0_i32, %c0_i32_0 : i32, i32
  }
  func.func @transform_3(%arg0: i32) -> (i32, i32) {
    %c0_i32 = arith.constant 0 : i32
    %c0_i32_0 = arith.constant 0 : i32
    %c0_i32_1 = arith.constant 0 : i32
    return %c0_i32, %c0_i32_0 : i32, i32
  }
  func.func @transform_4(%arg0: i32) -> (i32, i32) {
    %c0_i32 = arith.constant 0 : i32
    %c0_i32_0 = arith.constant 0 : i32
    %c0_i32_1 = arith.constant 0 : i32
    return %c0_i32, %c0_i32_0 : i32, i32
  }
  func.func @transform_5(%arg0: i32) -> (i32, i32) {
    %c0_i32 = arith.constant 0 : i32
    %c0_i32_0 = arith.constant 0 : i32
    %c0_i32_1 = arith.constant 0 : i32
    return %c0_i32, %c0_i32_0 : i32, i32
  }
  func.func @transform_6(%arg0: i32) -> (i32, i32) {
    %c0_i32 = arith.constant 0 : i32
    %c0_i32_0 = arith.constant 0 : i32
    %c0_i32_1 = arith.constant 0 : i32
    return %c0_i32, %c0_i32_0 : i32, i32
  }
  func.func @transform_7(%arg0: i32) -> (i32, i32) {
    %c0_i32 = arith.constant 0 : i32
    %c0_i32_0 = arith.constant 0 : i32
    return %arg0, %c0_i32 : i32, i32
  }
}

</mosaic_0001>

<bundles_post_ra>
// kernel: dqn_forward.1
= control target key start
LH: loop header
LB: loop body
LE: loop exit
PB: predicated region body
PF: predicated region fallthrough
CT: control target
= control target key end

     0   :  { %12 = vsyncpa [#allocation3], 0  ;;  %s391_s24 = smov [#allocation2]   ;;  %s486_s0 = inlined_call_operand.vmem [shape: f32[16,4], index: 0, kind: input, shape index: {}]   ;;  %s487_s1 = inlined_call_operand.vmem [shape: bf16[4,64], index: 1, kind: input, shape index: {}]   ;;  %s488_s2 = inlined_call_operand.vmem [shape: f32[1,64], index: 2, kind: input, shape index: {}]   ;;  %s489_s3 = inlined_call_operand.vmem [shape: bf16[64,64], index: 3, kind: input, shape index: {}]   ;;  %s490_s4 = inlined_call_operand.vmem [shape: f32[1,64], index: 4, kind: input, shape index: {}]   ;;  %s491_s5 = inlined_call_operand.hbm [shape: bf16[64,128], index: 5, kind: input, shape index: {}]   ;;  %s492_s6 = inlined_call_operand.vmem [shape: f32[1,128], index: 6, kind: input, shape index: {}]   ;;  %s493_s7 = inlined_call_operand.vmem [shape: bf16[16,128], index: 7, kind: output, shape index: {}]  }
   0x1   :  { %s28_s25 = sshll.u32 %s391_s24, 4  ;;  %s367_s28 = scalar_lea.hbm %s491_s5, 512  ;;  %s29_s25 = int_to_ptr.vmem [resolvable:$true] %s28_s25 }
   0x2   :  { %p368_p0 = scmp.ne.s32.totalorder %s491_s5, %s367_s28  ;;  %p371_p1 = scmp.lt.u32.totalorder %s367_s28, %s491_s5 }
   0x4   :  { %p373_p2 = pnand %p371_p1, %p368_p0 }
   0x6   :  { %376 = shalt.err (!%p373_p2)
}
   0x7   :  { %s377_s10 = scalar_lea.vmem %s29_s25, 512  ;;  %p382_p4 = scmp.lt.s32.totalorder %s29_s25, %s29_s25 }
   0x8   :  { %p378_p3 = scmp.ne.s32.totalorder %s29_s25, %s377_s10  ;;  %p383_p5 = scmp.lt.s32.totalorder %s377_s10, %s377_s10 }
   0xa   :  { %p384_p6 = por %p383_p5, %p382_p4 }
   0xc   :  { %p385_p7 = pnand %p384_p6, %p378_p3 }
   0xe   :  { %388 = shalt.err (!%p385_p7)
}
   0xf   :  { %s392_s11 = smov 64   ;;  %s393_s12 = smov 4  }
  0x10   :  { %34 = dma.hbm_to_vmem [thread:$0]  %s491_s5, 512, %s29_s25, [#allocation3], %s392_s11, %s392_s11, %s393_s12  }
  0x11   :  { %389 = dma.done.wait [#allocation3], 512  }
  0x12   :  { %390 = vsyncadd [#allocation3], 4294966784  ;;  %v394_v0 = vmov 0.0   ;;  %vm395_vm0 = vmmov 0   ;;  %vm56_vm1 = vcmask 1041408   ;;  %v41_v2 = vld [vmem:[%s486_s0] sm:$0xff] }
  0x13   :  { %324 = vmatprep.subr.bf16.mxu0 %v394_v0  ;;  %326 = vmatprep.mubr.msk.bf16.mxu0 %vm395_vm0, %v394_v0  ;;  %v44_v1 = vld [vmem:[%s487_s1] sm:$0x3]  ;;  %v42_v3 = vld [vmem:[%s486_s0 + $0x8] sm:$0xff]  ;;  %vm52_vm2 = vcmask 31744   ;;  %v361_v8 = vld [vmem:[%s489_s3 + $0x10] sm:$0xff]   ;;  %vm143_vm3 = vcmask 523264  }
  0x14   :  { %330 = vmatprep.subr.bf16.mxu1 %v394_v0  ;;  %338 = vmatprep.mubr.msk.bf16.mxu1 %vm395_vm0, %v394_v0  ;;  %v58_v4 = vsel %vm56_vm1, %v44_v1, 0  ;;  %v43_v5 = vpack.c.bf16 %v42_v3, %v41_v2  ;;  %v359_v6 = vld [vmem:[%s489_s3] sm:$0xff]   ;;  %v360_v7 = vld [vmem:[%s489_s3 + $0x8] sm:$0xff]   ;;  %v362_v9 = vld [vmem:[%s489_s3 + $0x18] sm:$0xff]  }
  0x15   :  { %325 = vmatpush3.bf16.msra.mxu0 %v58_v4  ;;  %331 = vmatpush3.bf16.msra.mxu1 %v359_v6  ;;  %v363_v10 = vld [vmem:[#allocation2] sm:$0xff]   ;;  %v364_v11 = vld [vmem:[#allocation2 + $0x8] sm:$0xff]   ;;  %v365_v22 = vld [vmem:[#allocation2 + $0x10] sm:$0xff]  }
  0x16   :  { %342 = vmatprep.subr.bf16.mxu0 %v394_v0  ;;  %332 = vmatprep.subr.bf16.mxu1 %v394_v0  ;;  %v289_v12 = vld [vmem:[%s488_s2] ss:$0 sm:$0xff]  ;;  %v366_v23 = vld [vmem:[#allocation2 + $0x18] sm:$0xff]  }
  0x17   :  { %v291_v24 = vld [vmem:[%s490_s4] ss:$0 sm:$0xff] }
  0x18   :  { %327 = vmatmul.mubr.msk.bf16.vlgmr.msra.gmra.mrb[0].mxu0 %vm52_vm2, %v43_v5  ;;  %v297_v34 = vld [vmem:[%s492_s6] ss:$0 sm:$0xff] }
  0x19   :  { %350 = vmatprep.mubr.msk.bf16.mxu0 %vm395_vm0, %v394_v0  ;;  %333 = vmatpush3.bf16.msra.mxu1 %v360_v7 }
  0x1a   :  { %334 = vmatprep.subr.bf16.mxu1 %v394_v0  ;;  %343 = vmatpush3.bf16.msra.mxu0 %v363_v10 }
  0x1b   :  { %344 = vmatprep.subr.bf16.mxu0 %v394_v0 }
  0x1d   :  { %335 = vmatpush3.bf16.msra.mxu1 %v361_v8 }
  0x1e   :  { %336 = vmatprep.subr.bf16.mxu1 %v394_v0  ;;  %345 = vmatpush3.bf16.msra.mxu0 %v364_v11 }
  0x1f   :  { %346 = vmatprep.subr.bf16.mxu0 %v394_v0 }
  0x21   :  { %337 = vmatpush3.bf16.msra.mxu1 %v362_v9 }
  0x22   :  { %347 = vmatpush3.bf16.msra.mxu0 %v365_v22 }
  0x23   :  { %348 = vmatprep.subr.bf16.mxu0 %v394_v0 }
  0x26   :  { %349 = vmatpush3.bf16.msra.mxu0 %v366_v23 }
  0xeb   :  { %v94_v13 = vpop.f32.mrb[0].mxu0 }
  0xec   :  { %v95_v14 = vadd.f32 %v289_v12, %v94_v13  ;;  %v328_v15 = vpop.f32.mrb[1].mxu0 }
  0xed   :  { %v97_v16 = vpop.f32.mrb[2].mxu0 }
  0xee   :  { %v98_v17 = vadd.f32 %v289_v12, %v97_v16  ;;  %v329_v18 = vpop.f32.mrb[3].mxu0  ;;  %v101_v19 = vmax.f32 %v95_v14, 0.0 }
  0xf0   :  { %v102_v20 = vmax.f32 %v98_v17, 0.0 }
  0xf2   :  { %v103_v21 = vpack.c.bf16 %v102_v20, %v101_v19 }
  0xf4   :  { %339 = vmatmul.mubr.msk.bf16.vlgmr.msra.gmra.mrb[0].mxu1 %vm143_vm3, %v103_v21 }
 0x1c7   :  { %v181_v25 = vpop.f32.mrb[0].mxu1 }
 0x1c8   :  { %v182_v26 = vadd.f32 %v291_v24, %v181_v25  ;;  %v340_v27 = vpop.f32.mrb[1].mxu1 }
 0x1c9   :  { %v184_v28 = vpop.f32.mrb[2].mxu1 }
 0x1ca   :  { %v185_v29 = vadd.f32 %v291_v24, %v184_v28  ;;  %v341_v30 = vpop.f32.mrb[3].mxu1  ;;  %v188_v31 = vmax.f32 %v182_v26, 0.0 }
 0x1cc   :  { %v189_v32 = vmax.f32 %v185_v29, 0.0 }
 0x1ce   :  { %v190_v33 = vpack.c.bf16 %v189_v32, %v188_v31 }
 0x1d0   :  { %351 = vmatmul.mubr.msk.bf16.vlgmr.msra.gmra.mrb[4].mxu0 %vm143_vm3, %v190_v33 }
 0x2a3   :  { %v267_v35 = vpop.f32.mrb[4].mxu0 }
 0x2a4   :  { %v352_v36 = vpop.f32.mrb[5].mxu0  ;;  %v268_v38 = vadd.f32 %v297_v34, %v267_v35 }
 0x2a5   :  { %v270_v37 = vpop.f32.mrb[6].mxu0 }
 0x2a6   :  { %v271_v39 = vadd.f32 %v297_v34, %v270_v37  ;;  %v353_v40 = vpop.f32.mrb[7].mxu0 }
 0x2a8   :  { %v310_v41 = vpack.c.bf16 %v271_v39, %v268_v38 }
 0x2aa   :  { %311 = vst [vmem:[%s493_s7] sm:$0xff] %v310_v41  }
 0x2ab   :  { %288 = vsyncpa [#allocation3], 1 }

</bundles_post_ra>
